<compile_context>
chip_gen: v7x
topology: tpu7x:2x2x1
jax: 0.10.0
libtpu: 0.0.40
codegen_flags: <defaults>
</compile_context>

<pallas_src>
import jax
import jax.numpy as jnp
from jax import lax
from jax.experimental import pallas as pl
from jax.experimental.pallas import tpu as pltpu

# ----------------------------- model config (small, synthetic) ---------------
B = 2            # batch
S = 8            # sequence length
D_MODEL = 32     # d_model
NUM_HEADS = 4
D_KV = 8         # per-head dim
INNER = NUM_HEADS * D_KV         # 32
D_FF = 64        # feed-forward width (T5 v1.1 gated-GELU FF)
NUM_LAYERS = 2
REL_NUM_BUCKETS = 8
REL_MAX_DISTANCE = 16
LN_EPS = 1e-6
NEG_INF = jnp.finfo(jnp.float32).min
BS = B * S


# ----------------------------- fused encoder kernel --------------------------
def _rmsnorm(x, w):
    # T5 LayerNorm: RMS norm (no mean subtraction, no bias); f32 variance.
    var = jnp.mean(x * x, axis=-1, keepdims=True)
    return x * lax.rsqrt(var + LN_EPS) * w


def _encoder_kernel(bias_ref, x0_ref,
                    ln1_ref, wqkv_ref, wo_ref,
                    ln2_ref, wi_ref, woff_ref,
                    final_ln_ref,
                    out_ref, hid_ref):
    li = pl.program_id(0)

    # Load the initial embeddings into the resident VMEM hidden-state scratch.
    @pl.when(li == 0)
    def _():
        hid_ref[...] = x0_ref[...]

    hidden = hid_ref[...]                                   # [B*S, D]

    # ---------------- self-attention sub-block (fused) ----------------
    normed = _rmsnorm(hidden, ln1_ref[0])                   # [B*S, D]
    qkv = jnp.dot(normed, wqkv_ref[0],
                  preferred_element_type=jnp.float32)       # [B*S, 3*INNER]
    wo = wo_ref[0]                                          # [INNER, D]

    attn_out = jnp.zeros((BS, D_MODEL), jnp.float32)
    for h in range(NUM_HEADS):                              # unrolled, VMEM-resident
        qh = qkv[:, h * D_KV:(h + 1) * D_KV]                            # [B*S, Dk]
        kh = qkv[:, INNER + h * D_KV:INNER + (h + 1) * D_KV]            # [B*S, Dk]
        vh = qkv[:, 2 * INNER + h * D_KV:2 * INNER + (h + 1) * D_KV]    # [B*S, Dk]
        # T5: no 1/sqrt(d) scaling; block-diagonal bias keeps batches separate.
        # Contract on the last dim of both -> Q @ K^T without materializing kh.T.
        s = lax.dot_general(qh, kh,
                            dimension_numbers=(((1,), (1,)), ((), ())),
                            preferred_element_type=jnp.float32) + bias_ref[h]
        m = jnp.max(s, axis=-1, keepdims=True)
        p = jnp.exp(s - m)
        p = p * pl.reciprocal(jnp.sum(p, axis=-1, keepdims=True), approx=True)
        ah = jnp.dot(p, vh, preferred_element_type=jnp.float32)         # [B*S, Dk]
        # Fold per-head output projection: sum_h ah @ wo[h*Dk:(h+1)*Dk, :]
        attn_out = attn_out + jnp.dot(ah, wo[h * D_KV:(h + 1) * D_KV, :],
                                      preferred_element_type=jnp.float32)
    hidden = hidden + attn_out

    # ---------------- gated-GELU feed-forward sub-block (fused) -------
    normed2 = _rmsnorm(hidden, ln2_ref[0])                  # [B*S, D]
    hcat = jnp.dot(normed2, wi_ref[0],
                   preferred_element_type=jnp.float32)      # [B*S, 2*D_FF] (128 lanes)
    hg = hcat[:, :D_FF]
    hl = hcat[:, D_FF:]
    hg = 0.5 * hg * (1.0 + jnp.tanh(0.7978845608028654 *
                                    (hg + 0.044715 * hg * hg * hg)))    # gelu_new
    ff = jnp.dot(hg * hl, woff_ref[0],
                 preferred_element_type=jnp.float32)        # [B*S, D]
    hidden = hidden + ff

    hid_ref[...] = hidden

    # Final T5 RMSNorm applied only after the last layer.
    @pl.when(li == NUM_LAYERS - 1)
    def _():
        out_ref[...] = _rmsnorm(hidden, final_ln_ref[...])


def encoder_pallas(bias, x0, params):
    """One pallas_call running all encoder layers; returns [B*S, D_MODEL] f32."""
    return pl.pallas_call(
        _encoder_kernel,
        out_shape=jax.ShapeDtypeStruct((BS, D_MODEL), jnp.float32),
        grid=(NUM_LAYERS,),
        in_specs=[
            pl.BlockSpec((NUM_HEADS, BS, BS), lambda l: (0, 0, 0)),        # bias (const)
            pl.BlockSpec((BS, D_MODEL), lambda l: (0, 0)),                 # x0 (const)
            pl.BlockSpec((1, 1, D_MODEL), lambda l: (l, 0, 0)),            # ln1[l]
            pl.BlockSpec((1, D_MODEL, 3 * INNER), lambda l: (l, 0, 0)),    # wqkv[l]
            pl.BlockSpec((1, INNER, D_MODEL), lambda l: (l, 0, 0)),        # wo[l]
            pl.BlockSpec((1, 1, D_MODEL), lambda l: (l, 0, 0)),            # ln2[l]
            pl.BlockSpec((1, D_MODEL, 2 * D_FF), lambda l: (l, 0, 0)),     # wi[l]
            pl.BlockSpec((1, D_FF, D_MODEL), lambda l: (l, 0, 0)),         # wo_ff[l]
            pl.BlockSpec((1, D_MODEL), lambda l: (0, 0)),                  # final_ln
        ],
        out_specs=pl.BlockSpec((BS, D_MODEL), lambda l: (0, 0)),
        scratch_shapes=[pltpu.VMEM((BS, D_MODEL), jnp.float32)],           # hidden state
        compiler_params=pltpu.CompilerParams(
            dimension_semantics=("arbitrary",)),                           # layers are sequential
    )(bias, x0,
      params["ln1"], params["wqkv"], params["wo"],
      params["ln2"], params["wi"], params["wo_ff"],
      params["final_ln"])


# --------------------- relative position bias (plain-JAX glue) ----------------
def _relative_position_bucket(relative_position, num_buckets, max_distance):
    # Bidirectional (encoder) bucketing, identical to HF T5.
    num_buckets = num_buckets // 2
    relative_buckets = (relative_position > 0).astype(jnp.int32) * num_buckets
    relative_position = jnp.abs(relative_position)
    max_exact = num_buckets // 2
    is_small = relative_position < max_exact
    rel_f = jnp.maximum(relative_position, 1).astype(jnp.float32)
    rel_if_large = max_exact + (
        jnp.log(rel_f / max_exact) / jnp.log(max_distance / max_exact)
        * (num_buckets - max_exact)
    ).astype(jnp.int32)
    rel_if_large = jnp.minimum(rel_if_large, num_buckets - 1)
    return relative_buckets + jnp.where(is_small, relative_position, rel_if_large)


def compute_position_bias(rel_bias_table, seq_len):
    ctx = jnp.arange(seq_len, dtype=jnp.int32)[:, None]
    mem = jnp.arange(seq_len, dtype=jnp.int32)[None, :]
    buckets = _relative_position_bucket(mem - ctx, REL_NUM_BUCKETS, REL_MAX_DISTANCE)
    values = jnp.take(rel_bias_table, buckets, axis=0)      # [S, S, H]
    return jnp.transpose(values, (2, 0, 1))[None, ...]      # [1, H, S, S]


# ----------------------------- parameter init ---------------------------------
def init_params(key):
    def nrm(k, shape, scale=0.05):
        return (scale * jax.random.normal(k, shape)).astype(jnp.float32)

    keys = jax.random.split(key, 5)
    return {
        "rel_bias": nrm(keys[0], (REL_NUM_BUCKETS, NUM_HEADS), 0.5),
        # Stacked per-layer weights (leading layer axis streamed by the grid).
        "ln1": jnp.ones((NUM_LAYERS, 1, D_MODEL), jnp.float32),
        "wqkv": nrm(keys[1], (NUM_LAYERS, D_MODEL, 3 * INNER)),   # wq|wk|wv fused
        "wo": nrm(keys[2], (NUM_LAYERS, INNER, D_MODEL)),
        "ln2": jnp.ones((NUM_LAYERS, 1, D_MODEL), jnp.float32),
        "wi": nrm(keys[3], (NUM_LAYERS, D_MODEL, 2 * D_FF)),      # wi_0|wi_1 fused
        "wo_ff": nrm(keys[4], (NUM_LAYERS, D_FF, D_MODEL)),
        "final_ln": jnp.ones((1, D_MODEL), jnp.float32),
    }


# ----------------------------- encoder forward ---------------------------------
def encoder_forward(params, inputs_embeds, attention_mask):
    """Equivalent of Encoder.forward: returns last_hidden_state [B, S, D]."""
    b, s, d = inputs_embeds.shape

    # extended additive mask, as in HF: (1 - mask) * finfo.min
    ext_mask = (1.0 - attention_mask.astype(jnp.float32))[:, None, None, :] * NEG_INF
    pos_bias = compute_position_bias(params["rel_bias"], s)      # [1,H,S,S]
    combined = pos_bias + ext_mask                               # [B,H,S,S]

    # Block-diagonal bias over the flattened (B*S) token axis so one kernel
    # computes attention for all batches/heads without cross-batch mixing.
    # Built fully vectorized (no Python loop over batch).
    full = jnp.transpose(combined, (1, 0, 2, 3))                 # [H,B,S,S]
    blkdiag = jnp.einsum("hbqk,bc->hbqck", full,
                         jnp.eye(b, dtype=jnp.float32))          # [H,B,S,B,S]
    blkdiag = blkdiag.reshape(NUM_HEADS, b * s, b * s)
    batch_ids = jnp.repeat(jnp.arange(b), s)
    same_batch = batch_ids[:, None] == batch_ids[None, :]        # [BS,BS]
    bias = jnp.where(same_batch[None, :, :], blkdiag, NEG_INF)   # [H,BS,BS]

    x0 = inputs_embeds.reshape(b * s, d).astype(jnp.float32)
    out = encoder_pallas(bias, x0, params)
    return out.reshape(b, s, d)


# ----------------------------- padding_caption analogue ------------------------
def padding_caption(attention_mask, length):
    # mirrors: caption.attention_mask[0][:length] = 1
    return attention_mask.at[0, :length].set(1.0)


# ----------------------------- main ---------------------------------------------
if __name__ == "__main__":
    key = jax.random.PRNGKey(0)
    k_param, k_emb = jax.random.split(key)

    params = init_params(k_param)

    # synthetic inputs_embeds (stands in for text_encoder.get_input_embeddings()(input_ids))
    inputs_embeds = jax.random.normal(k_emb, (B, S, D_MODEL), dtype=jnp.float32)

    # synthetic attention mask: sample 0 has 3 valid tokens, sample 1 has 5,
    # then padding_caption forces the first 6 positions of sample 0 to 1.
    lengths = jnp.array([3, 5], dtype=jnp.int32)
    attention_mask = (jnp.arange(S)[None, :] < lengths[:, None]).astype(jnp.float32)
    attention_mask = padding_caption(attention_mask, 6)

    caption_embs = encoder_forward(params, inputs_embeds, attention_mask)
    caption_embs = jax.block_until_ready(caption_embs)

    assert caption_embs.shape == (B, S, D_MODEL)
    assert bool(jnp.all(jnp.isfinite(caption_embs)))
    print("KERNEL_OK")
</pallas_src>

<mosaic_0001>
module attributes {stable_mosaic.version = 11 : i64} {
  func.func @_encoder_kernel(%arg0: i32, %arg1: memref<4x16x16xf32, #tpu.memory_space<vmem>>, %arg2: memref<16x32xf32, #tpu.memory_space<vmem>>, %arg3: memref<1x1x32xf32, #tpu.memory_space<vmem>>, %arg4: memref<1x32x96xf32, #tpu.memory_space<vmem>>, %arg5: memref<1x32x32xf32, #tpu.memory_space<vmem>>, %arg6: memref<1x1x32xf32, #tpu.memory_space<vmem>>, %arg7: memref<1x32x128xf32, #tpu.memory_space<vmem>>, %arg8: memref<1x64x32xf32, #tpu.memory_space<vmem>>, %arg9: memref<1x32xf32, #tpu.memory_space<vmem>>, %arg10: memref<16x32xf32, #tpu.memory_space<vmem>>, %arg11: memref<16x32xf32, #tpu.memory_space<vmem>>) attributes {dimension_semantics = [#tpu.dimension_semantics<arbitrary>], iteration_bounds = array<i64: 2>, scalar_prefetch = 0 : i64, scratch_operands = 1 : i64, tpu.core_type = #tpu.core_type<tc>, window_params = [{pipeline_mode = #tpu.pipeline_mode<synchronous>, transform_indices = @transform_0, window_bounds = array<i64: 4, 16, 16>}, {pipeline_mode = #tpu.pipeline_mode<synchronous>, transform_indices = @transform_1, window_bounds = array<i64: 16, 32>}, {transform_indices = @transform_2, window_bounds = array<i64: 1, 1, 32>}, {transform_indices = @transform_3, window_bounds = array<i64: 1, 32, 96>}, {transform_indices = @transform_4, window_bounds = array<i64: 1, 32, 32>}, {transform_indices = @transform_5, window_bounds = array<i64: 1, 1, 32>}, {transform_indices = @transform_6, window_bounds = array<i64: 1, 32, 128>}, {transform_indices = @transform_7, window_bounds = array<i64: 1, 64, 32>}, {pipeline_mode = #tpu.pipeline_mode<synchronous>, transform_indices = @transform_8, window_bounds = array<i64: 1, 32>}, {pipeline_mode = #tpu.pipeline_mode<synchronous>, transform_indices = @transform_9, window_bounds = array<i64: 16, 32>}]} {
    %c0_i32 = arith.constant 0 : i32
    %0 = arith.cmpi eq, %arg0, %c0_i32 : i32
    %1 = arith.extui %0 : i1 to i32
    %c0_i32_0 = arith.constant 0 : i32
    %2 = arith.cmpi ne, %1, %c0_i32_0 : i32
    scf.if %2 {
      %c0_65 = arith.constant 0 : index
      %c0_66 = arith.constant 0 : index
      %150 = vector.load %arg2[%c0_65, %c0_66] : memref<16x32xf32, #tpu.memory_space<vmem>>, vector<16x32xf32>
      %c0_67 = arith.constant 0 : index
      %c0_68 = arith.constant 0 : index
      %151 = vector.load %arg11[%c0_67, %c0_68] : memref<16x32xf32, #tpu.memory_space<vmem>>, vector<16x32xf32>
      tpu.vector_store %arg11[%c0_67, %c0_68], %150 {strides = array<i32>} : memref<16x32xf32, #tpu.memory_space<vmem>>, vector<16x32xf32>,
    } else {
    }
    %c0 = arith.constant 0 : index
    %c0_1 = arith.constant 0 : index
    %3 = vector.load %arg11[%c0, %c0_1] : memref<16x32xf32, #tpu.memory_space<vmem>>, vector<16x32xf32>
    %c0_2 = arith.constant 0 : index
    %c0_3 = arith.constant 0 : index
    %c0_4 = arith.constant 0 : index
    %4 = vector.load %arg3[%c0_2, %c0_3, %c0_4] : memref<1x1x32xf32, #tpu.memory_space<vmem>>, vector<1x1x32xf32>
    %5 = vector.shape_cast %4 : vector<1x1x32xf32> to vector<1x32xf32>
    %6 = arith.mulf %3, %3 : vector<16x32xf32>
    %cst = arith.constant dense<0.000000e+00> : vector<16xf32>
    %7 = vector.multi_reduction <add>, %6, %cst [1] : vector<16x32xf32> to vector<16xf32>
    %8 = vector.shape_cast %7 : vector<16xf32> to vector<16x1xf32>
    %cst_5 = arith.constant 3.200000e+01 : f32
    %9 = vector.broadcast %cst_5 : f32 to vector<16x1xf32>
    %10 = arith.divf %8, %9 : vector<16x1xf32>
    %cst_6 = arith.constant 9.99999997E-7 : f32
    %11 = vector.broadcast %cst_6 : f32 to vector<16x1xf32>
    %12 = arith.addf %10, %11 : vector<16x1xf32>
    %13 = math.rsqrt %12 : vector<16x1xf32>
    %14 = vector.broadcast %13 : vector<16x1xf32> to vector<16x32xf32>
    %15 = arith.mulf %3, %14 : vector<16x32xf32>
    %16 = vector.broadcast %5 : vector<1x32xf32> to vector<16x32xf32>
    %17 = arith.mulf %15, %16 : vector<16x32xf32>
    %c0_7 = arith.constant 0 : index
    %c0_8 = arith.constant 0 : index
    %c0_9 = arith.constant 0 : index
    %18 = vector.load %arg4[%c0_7, %c0_8, %c0_9] : memref<1x32x96xf32, #tpu.memory_space<vmem>>, vector<1x32x96xf32>
    %19 = vector.shape_cast %18 : vector<1x32x96xf32> to vector<32x96xf32>
    %cst_10 = arith.constant dense<0.000000e+00> : vector<16x96xf32>
    %20 = tpu.matmul %17, %19, %cst_10 {dimension_numbers = #tpu.dot_dimension_numbers<[1], [0], [0], [1], [0, 0, 1, 1], [], []>} : vector<16x32xf32>, vector<32x96xf32>, vector<16x96xf32> -> vector<16x96xf32>
    %c0_11 = arith.constant 0 : index
    %c0_12 = arith.constant 0 : index
    %c0_13 = arith.constant 0 : index
    %21 = vector.load %arg5[%c0_11, %c0_12, %c0_13] : memref<1x32x32xf32, #tpu.memory_space<vmem>>, vector<1x32x32xf32>
    %22 = vector.shape_cast %21 : vector<1x32x32xf32> to vector<32x32xf32>
    %cst_14 = arith.constant 0.000000e+00 : f32
    %23 = vector.broadcast %cst_14 : f32 to vector<16x32xf32>
    %24 = vector.extract_strided_slice %20 {offsets = [0, 0], sizes = [16, 8], strides = [1, 1]} : vector<16x96xf32> to vector<16x8xf32>
    %25 = vector.extract_strided_slice %20 {offsets = [0, 32], sizes = [16, 8], strides = [1, 1]} : vector<16x96xf32> to vector<16x8xf32>
    %26 = vector.extract_strided_slice %20 {offsets = [0, 64], sizes = [16, 8], strides = [1, 1]} : vector<16x96xf32> to vector<16x8xf32>
    %cst_15 = arith.constant dense<0.000000e+00> : vector<16x16xf32>
    %27 = tpu.matmul %24, %25, %cst_15 {dimension_numbers = #tpu.dot_dimension_numbers<[1], [1], [0], [0], [0, 0, 1, 0], [], []>} : vector<16x8xf32>, vector<16x8xf32>, vector<16x16xf32> -> vector<16x16xf32>
    %c0_16 = arith.constant 0 : index
    %c0_17 = arith.constant 0 : index
    %c0_18 = arith.constant 0 : index
    %28 = vector.load %arg1[%c0_16, %c0_17, %c0_18] : memref<4x16x16xf32, #tpu.memory_space<vmem>>, vector<1x16x16xf32>
    %29 = vector.shape_cast %28 : vector<1x16x16xf32> to vector<16x16xf32>
    %30 = arith.addf %27, %29 : vector<16x16xf32>
    %cst_19 = arith.constant dense<0xFF800000> : vector<16xf32>
    %31 = vector.multi_reduction <maximumf>, %30, %cst_19 [1] : vector<16x16xf32> to vector<16xf32>
    %32 = vector.shape_cast %31 : vector<16xf32> to vector<16x1xf32>
    %33 = vector.broadcast %32 : vector<16x1xf32> to vector<16x16xf32>
    %34 = arith.subf %30, %33 : vector<16x16xf32>
    %35 = math.exp %34 : vector<16x16xf32>
    %cst_20 = arith.constant dense<0.000000e+00> : vector<16xf32>
    %36 = vector.multi_reduction <add>, %35, %cst_20 [1] : vector<16x16xf32> to vector<16xf32>
    %37 = vector.shape_cast %36 : vector<16xf32> to vector<16x1xf32>
    %38 = tpu.reciprocal %37 {approx = true} : vector<16x1xf32> -> vector<16x1xf32>
    %39 = vector.broadcast %38 : vector<16x1xf32> to vector<16x16xf32>
    %40 = arith.mulf %35, %39 : vector<16x16xf32>
    %cst_21 = arith.constant dense<0.000000e+00> : vector<16x8xf32>
    %41 = tpu.matmul %40, %26, %cst_21 {dimension_numbers = #tpu.dot_dimension_numbers<[1], [0], [0], [1], [0, 0, 1, 1], [], []>} : vector<16x16xf32>, vector<16x8xf32>, vector<16x8xf32> -> vector<16x8xf32>
    %42 = vector.extract_strided_slice %22 {offsets = [0, 0], sizes = [8, 32], strides = [1, 1]} : vector<32x32xf32> to vector<8x32xf32>
    %cst_22 = arith.constant dense<0.000000e+00> : vector<16x32xf32>
    %43 = tpu.matmul %41, %42, %cst_22 {dimension_numbers = #tpu.dot_dimension_numbers<[1], [0], [0], [1], [0, 0, 1, 1], [], []>} : vector<16x8xf32>, vector<8x32xf32>, vector<16x32xf32> -> vector<16x32xf32>
    %44 = arith.addf %23, %43 : vector<16x32xf32>
    %45 = vector.extract_strided_slice %20 {offsets = [0, 8], sizes = [16, 8], strides = [1, 1]} : vector<16x96xf32> to vector<16x8xf32>
    %46 = vector.extract_strided_slice %20 {offsets = [0, 40], sizes = [16, 8], strides = [1, 1]} : vector<16x96xf32> to vector<16x8xf32>
    %47 = vector.extract_strided_slice %20 {offsets = [0, 72], sizes = [16, 8], strides = [1, 1]} : vector<16x96xf32> to vector<16x8xf32>
    %cst_23 = arith.constant dense<0.000000e+00> : vector<16x16xf32>
    %48 = tpu.matmul %45, %46, %cst_23 {dimension_numbers = #tpu.dot_dimension_numbers<[1], [1], [0], [0], [0, 0, 1, 0], [], []>} : vector<16x8xf32>, vector<16x8xf32>, vector<16x16xf32> -> vector<16x16xf32>
    %c1 = arith.constant 1 : index
    %c0_24 = arith.constant 0 : index
    %c0_25 = arith.constant 0 : index
    %49 = vector.load %arg1[%c1, %c0_24, %c0_25] : memref<4x16x16xf32, #tpu.memory_space<vmem>>, vector<1x16x16xf32>
    %50 = vector.shape_cast %49 : vector<1x16x16xf32> to vector<16x16xf32>
    %51 = arith.addf %48, %50 : vector<16x16xf32>
    %cst_26 = arith.constant dense<0xFF800000> : vector<16xf32>
    %52 = vector.multi_reduction <maximumf>, %51, %cst_26 [1] : vector<16x16xf32> to vector<16xf32>
    %53 = vector.shape_cast %52 : vector<16xf32> to vector<16x1xf32>
    %54 = vector.broadcast %53 : vector<16x1xf32> to vector<16x16xf32>
    %55 = arith.subf %51, %54 : vector<16x16xf32>
    %56 = math.exp %55 : vector<16x16xf32>
    %cst_27 = arith.constant dense<0.000000e+00> : vector<16xf32>
    %57 = vector.multi_reduction <add>, %56, %cst_27 [1] : vector<16x16xf32> to vector<16xf32>
    %58 = vector.shape_cast %57 : vector<16xf32> to vector<16x1xf32>
    %59 = tpu.reciprocal %58 {approx = true} : vector<16x1xf32> -> vector<16x1xf32>
    %60 = vector.broadcast %59 : vector<16x1xf32> to vector<16x16xf32>
    %61 = arith.mulf %56, %60 : vector<16x16xf32>
    %cst_28 = arith.constant dense<0.000000e+00> : vector<16x8xf32>
    %62 = tpu.matmul %61, %47, %cst_28 {dimension_numbers = #tpu.dot_dimension_numbers<[1], [0], [0], [1], [0, 0, 1, 1], [], []>} : vector<16x16xf32>, vector<16x8xf32>, vector<16x8xf32> -> vector<16x8xf32>
    %63 = vector.extract_strided_slice %22 {offsets = [8, 0], sizes = [8, 32], strides = [1, 1]} : vector<32x32xf32> to vector<8x32xf32>
    %cst_29 = arith.constant dense<0.000000e+00> : vector<16x32xf32>
    %64 = tpu.matmul %62, %63, %cst_29 {dimension_numbers = #tpu.dot_dimension_numbers<[1], [0], [0], [1], [0, 0, 1, 1], [], []>} : vector<16x8xf32>, vector<8x32xf32>, vector<16x32xf32> -> vector<16x32xf32>
    %65 = arith.addf %44, %64 : vector<16x32xf32>
    %66 = vector.extract_strided_slice %20 {offsets = [0, 16], sizes = [16, 8], strides = [1, 1]} : vector<16x96xf32> to vector<16x8xf32>
    %67 = vector.extract_strided_slice %20 {offsets = [0, 48], sizes = [16, 8], strides = [1, 1]} : vector<16x96xf32> to vector<16x8xf32>
    %68 = vector.extract_strided_slice %20 {offsets = [0, 80], sizes = [16, 8], strides = [1, 1]} : vector<16x96xf32> to vector<16x8xf32>
    %cst_30 = arith.constant dense<0.000000e+00> : vector<16x16xf32>
    %69 = tpu.matmul %66, %67, %cst_30 {dimension_numbers = #tpu.dot_dimension_numbers<[1], [1], [0], [0], [0, 0, 1, 0], [], []>} : vector<16x8xf32>, vector<16x8xf32>, vector<16x16xf32> -> vector<16x16xf32>
    %c2 = arith.constant 2 : index
    %c0_31 = arith.constant 0 : index
    %c0_32 = arith.constant 0 : index
    %70 = vector.load %arg1[%c2, %c0_31, %c0_32] : memref<4x16x16xf32, #tpu.memory_space<vmem>>, vector<1x16x16xf32>
    %71 = vector.shape_cast %70 : vector<1x16x16xf32> to vector<16x16xf32>
    %72 = arith.addf %69, %71 : vector<16x16xf32>
    %cst_33 = arith.constant dense<0xFF800000> : vector<16xf32>
    %73 = vector.multi_reduction <maximumf>, %72, %cst_33 [1] : vector<16x16xf32> to vector<16xf32>
    %74 = vector.shape_cast %73 : vector<16xf32> to vector<16x1xf32>
    %75 = vector.broadcast %74 : vector<16x1xf32> to vector<16x16xf32>
    %76 = arith.subf %72, %75 : vector<16x16xf32>
    %77 = math.exp %76 : vector<16x16xf32>
    %cst_34 = arith.constant dense<0.000000e+00> : vector<16xf32>
    %78 = vector.multi_reduction <add>, %77, %cst_34 [1] : vector<16x16xf32> to vector<16xf32>
    %79 = vector.shape_cast %78 : vector<16xf32> to vector<16x1xf32>
    %80 = tpu.reciprocal %79 {approx = true} : vector<16x1xf32> -> vector<16x1xf32>
    %81 = vector.broadcast %80 : vector<16x1xf32> to vector<16x16xf32>
    %82 = arith.mulf %77, %81 : vector<16x16xf32>
    %cst_35 = arith.constant dense<0.000000e+00> : vector<16x8xf32>
    %83 = tpu.matmul %82, %68, %cst_35 {dimension_numbers = #tpu.dot_dimension_numbers<[1], [0], [0], [1], [0, 0, 1, 1], [], []>} : vector<16x16xf32>, vector<16x8xf32>, vector<16x8xf32> -> vector<16x8xf32>
    %84 = vector.extract_strided_slice %22 {offsets = [16, 0], sizes = [8, 32], strides = [1, 1]} : vector<32x32xf32> to vector<8x32xf32>
    %cst_36 = arith.constant dense<0.000000e+00> : vector<16x32xf32>
    %85 = tpu.matmul %83, %84, %cst_36 {dimension_numbers = #tpu.dot_dimension_numbers<[1], [0], [0], [1], [0, 0, 1, 1], [], []>} : vector<16x8xf32>, vector<8x32xf32>, vector<16x32xf32> -> vector<16x32xf32>
    %86 = arith.addf %65, %85 : vector<16x32xf32>
    %87 = vector.extract_strided_slice %20 {offsets = [0, 24], sizes = [16, 8], strides = [1, 1]} : vector<16x96xf32> to vector<16x8xf32>
    %88 = vector.extract_strided_slice %20 {offsets = [0, 56], sizes = [16, 8], strides = [1, 1]} : vector<16x96xf32> to vector<16x8xf32>
    %89 = vector.extract_strided_slice %20 {offsets = [0, 88], sizes = [16, 8], strides = [1, 1]} : vector<16x96xf32> to vector<16x8xf32>
    %cst_37 = arith.constant dense<0.000000e+00> : vector<16x16xf32>
    %90 = tpu.matmul %87, %88, %cst_37 {dimension_numbers = #tpu.dot_dimension_numbers<[1], [1], [0], [0], [0, 0, 1, 0], [], []>} : vector<16x8xf32>, vector<16x8xf32>, vector<16x16xf32> -> vector<16x16xf32>
    %c3 = arith.constant 3 : index
    %c0_38 = arith.constant 0 : index
    %c0_39 = arith.constant 0 : index
    %91 = vector.load %arg1[%c3, %c0_38, %c0_39] : memref<4x16x16xf32, #tpu.memory_space<vmem>>, vector<1x16x16xf32>
    %92 = vector.shape_cast %91 : vector<1x16x16xf32> to vector<16x16xf32>
    %93 = arith.addf %90, %92 : vector<16x16xf32>
    %cst_40 = arith.constant dense<0xFF800000> : vector<16xf32>
    %94 = vector.multi_reduction <maximumf>, %93, %cst_40 [1] : vector<16x16xf32> to vector<16xf32>
    %95 = vector.shape_cast %94 : vector<16xf32> to vector<16x1xf32>
    %96 = vector.broadcast %95 : vector<16x1xf32> to vector<16x16xf32>
    %97 = arith.subf %93, %96 : vector<16x16xf32>
    %98 = math.exp %97 : vector<16x16xf32>
    %cst_41 = arith.constant dense<0.000000e+00> : vector<16xf32>
    %99 = vector.multi_reduction <add>, %98, %cst_41 [1] : vector<16x16xf32> to vector<16xf32>
    %100 = vector.shape_cast %99 : vector<16xf32> to vector<16x1xf32>
    %101 = tpu.reciprocal %100 {approx = true} : vector<16x1xf32> -> vector<16x1xf32>
    %102 = vector.broadcast %101 : vector<16x1xf32> to vector<16x16xf32>
    %103 = arith.mulf %98, %102 : vector<16x16xf32>
    %cst_42 = arith.constant dense<0.000000e+00> : vector<16x8xf32>
    %104 = tpu.matmul %103, %89, %cst_42 {dimension_numbers = #tpu.dot_dimension_numbers<[1], [0], [0], [1], [0, 0, 1, 1], [], []>} : vector<16x16xf32>, vector<16x8xf32>, vector<16x8xf32> -> vector<16x8xf32>
    %105 = vector.extract_strided_slice %22 {offsets = [24, 0], sizes = [8, 32], strides = [1, 1]} : vector<32x32xf32> to vector<8x32xf32>
    %cst_43 = arith.constant dense<0.000000e+00> : vector<16x32xf32>
    %106 = tpu.matmul %104, %105, %cst_43 {dimension_numbers = #tpu.dot_dimension_numbers<[1], [0], [0], [1], [0, 0, 1, 1], [], []>} : vector<16x8xf32>, vector<8x32xf32>, vector<16x32xf32> -> vector<16x32xf32>
    %107 = arith.addf %86, %106 : vector<16x32xf32>
    %108 = arith.addf %3, %107 : vector<16x32xf32>
    %c0_44 = arith.constant 0 : index
    %c0_45 = arith.constant 0 : index
    %c0_46 = arith.constant 0 : index
    %109 = vector.load %arg6[%c0_44, %c0_45, %c0_46] : memref<1x1x32xf32, #tpu.memory_space<vmem>>, vector<1x1x32xf32>
    %110 = vector.shape_cast %109 : vector<1x1x32xf32> to vector<1x32xf32>
    %111 = arith.mulf %108, %108 : vector<16x32xf32>
    %cst_47 = arith.constant dense<0.000000e+00> : vector<16xf32>
    %112 = vector.multi_reduction <add>, %111, %cst_47 [1] : vector<16x32xf32> to vector<16xf32>
    %113 = vector.shape_cast %112 : vector<16xf32> to vector<16x1xf32>
    %cst_48 = arith.constant 3.200000e+01 : f32
    %114 = vector.broadcast %cst_48 : f32 to vector<16x1xf32>
    %115 = arith.divf %113, %114 : vector<16x1xf32>
    %cst_49 = arith.constant 9.99999997E-7 : f32
    %116 = vector.broadcast %cst_49 : f32 to vector<16x1xf32>
    %117 = arith.addf %115, %116 : vector<16x1xf32>
    %118 = math.rsqrt %117 : vector<16x1xf32>
    %119 = vector.broadcast %118 : vector<16x1xf32> to vector<16x32xf32>
    %120 = arith.mulf %108, %119 : vector<16x32xf32>
    %121 = vector.broadcast %110 : vector<1x32xf32> to vector<16x32xf32>
    %122 = arith.mulf %120, %121 : vector<16x32xf32>
    %c0_50 = arith.constant 0 : index
    %c0_51 = arith.constant 0 : index
    %c0_52 = arith.constant 0 : index
    %123 = vector.load %arg7[%c0_50, %c0_51, %c0_52] : memref<1x32x128xf32, #tpu.memory_space<vmem>>, vector<1x32x128xf32>
    %124 = vector.shape_cast %123 : vector<1x32x128xf32> to vector<32x128xf32>
    %cst_53 = arith.constant dense<0.000000e+00> : vector<16x128xf32>
    %125 = tpu.matmul %122, %124, %cst_53 {dimension_numbers = #tpu.dot_dimension_numbers<[1], [0], [0], [1], [0, 0, 1, 1], [], []>} : vector<16x32xf32>, vector<32x128xf32>, vector<16x128xf32> -> vector<16x128xf32>
    %126 = vector.extract_strided_slice %125 {offsets = [0, 0], sizes = [16, 64], strides = [1, 1]} : vector<16x128xf32> to vector<16x64xf32>
    %127 = vector.extract_strided_slice %125 {offsets = [0, 64], sizes = [16, 64], strides = [1, 1]} : vector<16x128xf32> to vector<16x64xf32>
    %cst_54 = arith.constant 5.000000e-01 : f32
    %128 = vector.broadcast %cst_54 : f32 to vector<16x64xf32>
    %129 = arith.mulf %128, %126 : vector<16x64xf32>
    %cst_55 = arith.constant 4.471500e-02 : f32
    %130 = vector.broadcast %cst_55 : f32 to vector<16x64xf32>
    %131 = arith.mulf %130, %126 : vector<16x64xf32>
    %132 = arith.mulf %131, %126 : vector<16x64xf32>
    %133 = arith.mulf %132, %126 : vector<16x64xf32>
    %134 = arith.addf %126, %133 : vector<16x64xf32>
    %cst_56 = arith.constant 0.797884583 : f32
    %135 = vector.broadcast %cst_56 : f32 to vector<16x64xf32>
    %136 = arith.mulf %135, %134 : vector<16x64xf32>
    %137 = math.tanh %136 : vector<16x64xf32>
    %cst_57 = arith.constant 1.000000e+00 : f32
    %138 = vector.broadcast %cst_57 : f32 to vector<16x64xf32>
    %139 = arith.addf %138, %137 : vector<16x64xf32>
    %140 = arith.mulf %129, %139 : vector<16x64xf32>
    %141 = arith.mulf %140, %127 : vector<16x64xf32>
    %c0_58 = arith.constant 0 : index
    %c0_59 = arith.constant 0 : index
    %c0_60 = arith.constant 0 : index
    %142 = vector.load %arg8[%c0_58, %c0_59, %c0_60] : memref<1x64x32xf32, #tpu.memory_space<vmem>>, vector<1x64x32xf32>
    %143 = vector.shape_cast %142 : vector<1x64x32xf32> to vector<64x32xf32>
    %cst_61 = arith.constant dense<0.000000e+00> : vector<16x32xf32>
    %144 = tpu.matmul %141, %143, %cst_61 {dimension_numbers = #tpu.dot_dimension_numbers<[1], [0], [0], [1], [0, 0, 1, 1], [], []>} : vector<16x64xf32>, vector<64x32xf32>, vector<16x32xf32> -> vector<16x32xf32>
    %145 = arith.addf %108, %144 : vector<16x32xf32>
    %c0_62 = arith.constant 0 : index
    %c0_63 = arith.constant 0 : index
    %146 = vector.load %arg11[%c0_62, %c0_63] : memref<16x32xf32, #tpu.memory_space<vmem>>, vector<16x32xf32>
    tpu.vector_store %arg11[%c0_62, %c0_63], %145 {strides = array<i32>} : memref<16x32xf32, #tpu.memory_space<vmem>>, vector<16x32xf32>,
    %c1_i32 = arith.constant 1 : i32
    %147 = arith.cmpi eq, %arg0, %c1_i32 : i32
    %148 = arith.extui %147 : i1 to i32
    %c0_i32_64 = arith.constant 0 : i32
    %149 = arith.cmpi ne, %148, %c0_i32_64 : i32
    scf.if %149 {
      %c0_65 = arith.constant 0 : index
      %c0_66 = arith.constant 0 : index
      %150 = vector.load %arg9[%c0_65, %c0_66] : memref<1x32xf32, #tpu.memory_space<vmem>>, vector<1x32xf32>
      %151 = arith.mulf %145, %145 : vector<16x32xf32>
      %cst_67 = arith.constant dense<0.000000e+00> : vector<16xf32>
      %152 = vector.multi_reduction <add>, %151, %cst_67 [1] : vector<16x32xf32> to vector<16xf32>
      %153 = vector.shape_cast %152 : vector<16xf32> to vector<16x1xf32>
      %cst_68 = arith.constant 3.200000e+01 : f32
      %154 = vector.broadcast %cst_68 : f32 to vector<16x1xf32>
      %155 = arith.divf %153, %154 : vector<16x1xf32>
      %cst_69 = arith.constant 9.99999997E-7 : f32
      %156 = vector.broadcast %cst_69 : f32 to vector<16x1xf32>
      %157 = arith.addf %155, %156 : vector<16x1xf32>
      %158 = math.rsqrt %157 : vector<16x1xf32>
      %159 = vector.broadcast %158 : vector<16x1xf32> to vector<16x32xf32>
      %160 = arith.mulf %145, %159 : vector<16x32xf32>
      %161 = vector.broadcast %150 : vector<1x32xf32> to vector<16x32xf32>
      %162 = arith.mulf %160, %161 : vector<16x32xf32>
      %c0_70 = arith.constant 0 : index
      %c0_71 = arith.constant 0 : index
      %163 = vector.load %arg10[%c0_70, %c0_71] : memref<16x32xf32, #tpu.memory_space<vmem>>, vector<16x32xf32>
      tpu.vector_store %arg10[%c0_70, %c0_71], %162 {strides = array<i32>} : memref<16x32xf32, #tpu.memory_space<vmem>>, vector<16x32xf32>,
    } else {
    }
    return
  }
  func.func @transform_0(%arg0: i32) -> (i32, i32, i32) {
    %c0_i32 = arith.constant 0 : i32
    %c0_i32_0 = arith.constant 0 : i32
    %c0_i32_1 = arith.constant 0 : i32
    %c0_i32_2 = arith.constant 0 : i32
    return %c0_i32, %c0_i32_0, %c0_i32_1 : i32, i32, i32
  }
  func.func @transform_1(%arg0: i32) -> (i32, i32) {
    %c0_i32 = arith.constant 0 : i32
    %c0_i32_0 = arith.constant 0 : i32
    %c0_i32_1 = arith.constant 0 : i32
    return %c0_i32, %c0_i32_0 : i32, i32
  }
  func.func @transform_2(%arg0: i32) -> (i32, i32, i32) {
    %c0_i32 = arith.constant 0 : i32
    %c0_i32_0 = arith.constant 0 : i32
    %c0_i32_1 = arith.constant 0 : i32
    return %arg0, %c0_i32, %c0_i32_0 : i32, i32, i32
  }
  func.func @transform_3(%arg0: i32) -> (i32, i32, i32) {
    %c0_i32 = arith.constant 0 : i32
    %c0_i32_0 = arith.constant 0 : i32
    %c0_i32_1 = arith.constant 0 : i32
    return %arg0, %c0_i32, %c0_i32_0 : i32, i32, i32
  }
  func.func @transform_4(%arg0: i32) -> (i32, i32, i32) {
    %c0_i32 = arith.constant 0 : i32
    %c0_i32_0 = arith.constant 0 : i32
    %c0_i32_1 = arith.constant 0 : i32
    return %arg0, %c0_i32, %c0_i32_0 : i32, i32, i32
  }
  func.func @transform_5(%arg0: i32) -> (i32, i32, i32) {
    %c0_i32 = arith.constant 0 : i32
    %c0_i32_0 = arith.constant 0 : i32
    %c0_i32_1 = arith.constant 0 : i32
    return %arg0, %c0_i32, %c0_i32_0 : i32, i32, i32
  }
  func.func @transform_6(%arg0: i32) -> (i32, i32, i32) {
    %c0_i32 = arith.constant 0 : i32
    %c0_i32_0 = arith.constant 0 : i32
    %c0_i32_1 = arith.constant 0 : i32
    return %arg0, %c0_i32, %c0_i32_0 : i32, i32, i32
  }
  func.func @transform_7(%arg0: i32) -> (i32, i32, i32) {
    %c0_i32 = arith.constant 0 : i32
    %c0_i32_0 = arith.constant 0 : i32
    %c0_i32_1 = arith.constant 0 : i32
    return %arg0, %c0_i32, %c0_i32_0 : i32, i32, i32
  }
  func.func @transform_8(%arg0: i32) -> (i32, i32) {
    %c0_i32 = arith.constant 0 : i32
    %c0_i32_0 = arith.constant 0 : i32
    %c0_i32_1 = arith.constant 0 : i32
    return %c0_i32, %c0_i32_0 : i32, i32
  }
  func.func @transform_9(%arg0: i32) -> (i32, i32) {
    %c0_i32 = arith.constant 0 : i32
    %c0_i32_0 = arith.constant 0 : i32
    %c0_i32_1 = arith.constant 0 : i32
    return %c0_i32, %c0_i32_0 : i32, i32
  }
}

</mosaic_0001>

<bundles_post_ra>
// kernel: tpu_custom_call.1
= control target key start
LH: loop header
LB: loop body
LE: loop exit
PB: predicated region body
PF: predicated region fallthrough
CT: control target
= control target key end

     0   :  { %s3167_s0 = inlined_call_operand.vmem [shape: f32[4,16,16], index: 0, kind: input, shape index: {}]   ;;  %s3168_s1 = inlined_call_operand.hbm [shape: f32[16,32], index: 1, kind: input, shape index: {}]   ;;  %s3169_s2 = inlined_call_operand.vmem [shape: f32[2,1,32], index: 2, kind: input, shape index: {}]   ;;  %s3170_s3 = inlined_call_operand.vmem [shape: f32[2,32,96], index: 3, kind: input, shape index: {}]   ;;  %s3171_s4 = inlined_call_operand.vmem [shape: f32[2,32,32], index: 4, kind: input, shape index: {}]   ;;  %s3172_s5 = inlined_call_operand.vmem [shape: f32[2,1,32], index: 5, kind: input, shape index: {}]   ;;  %s3173_s6 = inlined_call_operand.hbm [shape: f32[2,32,128], index: 6, kind: input, shape index: {}]   ;;  %s3174_s7 = inlined_call_operand.vmem [shape: f32[2,64,32], index: 7, kind: input, shape index: {}]   ;;  %s3175_s8 = inlined_call_operand.vmem [shape: f32[1,32], index: 8, kind: input, shape index: {}]   ;;  %s3176_s9 = inlined_call_operand.hbm [shape: f32[16,32], index: 9, kind: output, shape index: {}]  }
   0x1   :  { %3180 = sst [smem:[#allocation12_spill]] %s3168_s1 }
   0x2   :  { %14 = vsyncpa [#allocation4], 0 }
   0x3   :  { %15 = vsyncpa [#allocation7], 0 }
   0x4   :  { %17 = vsyncpa [#allocation7 + $0x1], 0 }
   0x5   :  { %18 = vsyncpa [#allocation5], 0  ;;  %s2788_s30 = smov 0   ;;  %s2790_s10 = smov 0  }
   0x6   :  { %s2792_s11 = smov 0   ;;  %s2794_s12 = smov 0  }
   0x7 LB: > { %s2807_s13 = sadd.s32 4294967295, %s2718_s12   ;;  %p190_p0 = scmp.ne.s32.totalorder %s2710_s10, %s2706_s30  ;;  %s2718_s12 = sphi %s2794_s12, %s3196_s12   ;;  %s2714_s11 = sphi %s2792_s11, %s3195_s11   ;;  %s2710_s10 = sphi %s2790_s10, %s3194_s10   ;;  %s2706_s30 = sphi %s2788_s30, %s3193_s30  }
   0x8   : > { %p3177_p1 = scmp.eq.s32.totalorder %s2807_s13, 0  ;;  %p2099_p2 = scmp.ge.s32.totalorder %s2718_s12, 1 }
   0x9   : > { %p269_p3 = scmp.lt.s32.totalorder %s2718_s12, 3  ;;  %s2720_s16 = smov [#allocation3]  }
   0xa   : > { %p2816_p5 = por %p3177_p1, %p190_p0  ;;  %s284_s17 = sshll.u32 %s2720_s16, 4  ;;  %s285_s17 = int_to_ptr.vmem [resolvable:$true] %s284_s17 }
   0xb   : > { %p2820_p6 = pnand %p2099_p2, %p269_p3  ;;  %s2833_s19 = sadd.s32 1, %s2718_s12  }
   0xc   : > { %s3181_s14 = scalar_select %p2816_p5, 1, 0 }
   0xd   : > { %s3182_s15 = scalar_select %p2820_p6, 1, 0 }
   0xe   : > { %p2442_p7 = pneg %p2820_p6  ;;  %s177_s20 = sadd.s32 1, %s2714_s11 }
   0xf   : > { %s174_s21 = ssub.s32 %s2718_s12, %s2833_s19  ;;  %s3184_s1 = sld [smem:[#allocation12_spill]] }
  0x10   : > { %p2828_p8 = pnand %p2442_p7, %p3177_p1 }
  0x12   : > { %p2594_p10 = pneg %p2828_p8 }
  0x15   : > { %s2592_s24 = scalar_lea.hbm %s3184_s1, 256 }
  0x16   : > { %p2593_p9 = scmp.ne.s32.totalorder %s3184_s1, %s2592_s24  ;;  %p2599_p13 = scmp.lt.u32.totalorder %s2592_s24, %s3184_s1 }
  0x18   : > { %p2595_p11 = pnand %p2594_p10, %p2593_p9 }
  0x1a   : > { %p2596_p12 = pneg %p2595_p11 }
  0x1c   : > { %p2601_p0 = pnand %p2599_p13, %p2596_p12 }
  0x1e   : > { %2604 = shalt.err (!%p2601_p0)
}
  0x1f   : > { %s2605_s29 = scalar_lea.vmem %s285_s17, 256  ;;  %p2613_p4 = scmp.lt.s32.totalorder %s285_s17, %s285_s17 }
  0x20   : > { %p2606_p2 = scmp.ne.s32.totalorder %s285_s17, %s2605_s29  ;;  %p2614_p1 = scmp.lt.s32.totalorder %s2605_s29, %s2605_s29 }
  0x22   : > { %p2608_p3 = pnand %p2606_p2, %p2594_p10  ;;  %p2615_p5 = por %p2614_p1, %p2613_p4 }
  0x24   : > { %p2609_p7 = pneg %p2608_p3 }
  0x26   : > { %p2616_p6 = pnand %p2615_p5, %p2609_p7 }
  0x28   : > { %2619 = shalt.err (!%p2616_p6)
}
  0x29   : > { %s2721_s30 = smov 128   ;;  %s2722_s16 = smov 8  }
  0x2a   : > { %2445 = dma.hbm_to_vmem [thread:$0]  (!%p2828_p8), %s3184_s1, 256, %s285_s17, [#allocation4], %s2721_s30, %s2721_s30, %s2722_s16  }
  0x2b   : > { %p175_p1 = scmp.eq.s32.totalorder %s174_s21, 0  ;;  %p184_p4 = scmp.ne.s32.totalorder %s2714_s11, %s2710_s10 }
  0x2c   : > { %p185_p5 = scmp.eq.s32.totalorder %s2718_s12, 0  ;;  %p2451_p6 = scmp.lt.s32.totalorder %s2718_s12, 2 }
  0x2d   : > { %s2862_s24 = scalar_select %p175_p1, %s2714_s11, %s177_s20  }
  0x2e   : > { %p186_p9 = por %p185_p5, %p184_p4  ;;  %s329_s25 = sand.u32 1, %s2714_s11  }
  0x2f   : > { %s2102_s26 = sshll.u32 %s329_s25, 5  ;;  %s2167_s27 = sshll.u32 %s2718_s12, 9 }
  0x30   : > { %s2869_s18 = scalar_lea.hbm %s3173_s6, %s2167_s27  ;;  %s333_s17 = scalar_lea.vmem [#allocation6], %s2102_s26 }
  0x31   : > { %s340_s21 = sshll.u32 %s333_s17, 4  ;;  %p2873_p8 = pnand %p2451_p6, %p186_p9  ;;  %s2871_s21 = int_to_ptr.vmem [resolvable:$true] %s340_s21 }
  0x32   : > { %s2877_s12 = scalar_lea.sflag [#allocation7], %s329_s25  ;;  %s2620_s22 = scalar_lea.hbm %s2869_s18, 512 }
  0x33   : > { %p2621_p10 = scmp.ne.s32.totalorder %s2869_s18, %s2620_s22  ;;  %p2622_p11 = pneg %p2873_p8 }
  0x34   : > { %s2625_s27 = scalar_lea.hbm %s3173_s6, 1024  ;;  %p2626_p0 = scmp.lt.u32.totalorder %s2869_s18, %s3173_s6 }
  0x35   : > { %p2623_p12 = pnand %p2622_p11, %p2621_p10  ;;  %p2627_p2 = scmp.lt.u32.totalorder %s2625_s27, %s2620_s22 }
  0x36   : > { %p2629_p7 = scmp.lt.u32.totalorder %s2620_s22, %s2869_s18 }
  0x37   : > { %p2624_p13 = pneg %p2623_p12  ;;  %p2628_p3 = por %p2627_p2, %p2626_p0 }
  0x39   : > { %p2630_p1 = por %p2629_p7, %p2628_p3 }
  0x3b   : > { %p2631_p4 = pnand %p2630_p1, %p2624_p13 }
  0x3d   : > { %2634 = shalt.err (!%p2631_p4)
}
  0x3e   : > { %s2635_s25 = scalar_lea.vmem %s2871_s21, 512  ;;  %s2723_s17 = smov [#allocation6]  }
  0x3f   : > { %p2636_p5 = scmp.ne.s32.totalorder %s2871_s21, %s2635_s25  ;;  %s2640_s23 = sshll.u32 %s2723_s17, 4  ;;  %s2641_s23 = int_to_ptr.vmem [resolvable:$false] %s2640_s23 }
  0x40   : > { %s2642_s26 = scalar_lea.vmem %s2641_s23, 1024  ;;  %p2643_p10 = scmp.lt.s32.totalorder %s2871_s21, %s2641_s23 }
  0x41   : > { %p2638_p6 = pnand %p2636_p5, %p2622_p11  ;;  %p2644_p12 = scmp.lt.s32.totalorder %s2642_s26, %s2635_s25 }
  0x43   : > { %p2639_p9 = pneg %p2638_p6  ;;  %p2645_p0 = por %p2644_p12, %p2643_p10 }
  0x45   : > { %p2646_p2 = pnand %p2645_p0, %p2639_p9 }
  0x47   : > { %2649 = shalt.err (!%p2646_p2)
}
  0x48   : > { %2449 = dma.hbm_to_vmem [thread:$0]  (!%p2873_p8), %s2869_s18, 512, %s2871_s21, %s2877_s12, %s2721_s30, %s2721_s30, %s2722_s16  }
  0x49   : > { %p3186_p11 = scmp.ne.s32.totalorder %s3182_s15, 0 }
  0x4a   : > { %p3187_p13 = scmp.eq.s32.totalorder (!%p3186_p11), %s2807_s13, 0 }
  0x4b   : > { %360 = sbr.rel (%p3186_p11) target bundleno = 3026 (0xbd2), region = 56 }
  0x52   : > { %2693 = dma.done.wait (%p3187_p13), [#allocation4], 256   ;;  %p3188_p3 = pmov %p3187_p13 }
  0x53   : > { %s366_s22 = sand.u32 1, %s2710_s10   ;;  %p3189_p7 = scmp.ne.s32.totalorder %s3181_s14, 0 }
  0x54   : > { %2695 = vsyncadd (%p3188_p3), [#allocation4], 4294967040  ;;  %s2107_s20 = sshll.u32 %s366_s22, 5  ;;  %s367_s27 = scalar_lea.sflag [#allocation7], %s366_s22 }
  0x55   : > { %s2915_s28 = scalar_lea.vmem [#allocation6], %s2107_s20 }
  0x56   : > { %2697 = dma.done.wait (%p3189_p7), %s367_s27, 512  }
  0x57   : > { %2699 = vsyncadd (%p3189_p7), %s367_s27, 4294966784  ;;  %p421_p8 = scmp.lt.s32.totalorder %s2807_s13, 1  ;;  %p3190_p1 = scmp.ne.s32.totalorder %s2807_s13, 0 }
  0x58   : > { %v446_v0 = vld [vmem:[#allocation3] sm:$0xff] (!%p3190_p1)  ;;  %vm448_vm0 = vcmask (!%p3190_p1), 261120   ;;  %v447_v1 = vld [vmem:[#allocation3 + $0x8] sm:$0xff] (!%p3190_p1) }
  0x59   : > { %s2923_s15 = scalar_select %p421_p8, %s2807_s13, 1 }
  0x5a   : > { %445 = sbr.rel (%p3190_p1) target bundleno = 97 (0x61), region = 68  ;;  %449 = vst.msk [vmem:[#allocation2] sm:$0xff] (!%p3190_p1), %vm448_vm0, %v446_v0  ;;  %450 = vst.msk [vmem:[#allocation2 + $0x8] sm:$0xff] (!%p3190_p1), %vm448_vm0, %v447_v1 }
  0x5b   : > { %s423_s18 = scalar_lea.vmem %s3169_s2, %s2923_s15  ;;  %s2168_s21 = sshll.u32 %s2923_s15, 5 }
  0x5c   : > { %s428_s25 = scalar_lea.vmem %s3170_s3, %s2168_s21  ;;  %s2936_s23 = scalar_lea.vmem %s3171_s4, %s2168_s21 }
  0x5d   : > { %s436_s20 = scalar_lea.vmem %s3172_s5, %s2923_s15  ;;  %s2170_s27 = sshll.u32 %s2923_s15, 6 }
  0x5e   : > { %s2946_s1 = scalar_lea.vmem %s3174_s7, %s2170_s27 }
  0x61 PF: > { %v2950_v2 = vld [vmem:[#allocation2] sm:$0xff]  ;;  %vm456_vm1 = vcmask 261120   ;;  %v2952_v3 = vld [vmem:[#allocation2 + $0x8] sm:$0xff]  ;;  %v482_v10 = vld [vmem:[%s428_s25 + $0x10] sm:$0xff]  ;;  %vm577_vm2 = vcmask 64512   ;;  %s2724_s29 = smov 120  }
  0x62   : > { %v454_v4 = vmul.f32 %v2950_v2, %v2950_v2  ;;  %v455_v5 = vmul.f32 %v2952_v3, %v2952_v3  ;;  %v480_v8 = vld [vmem:[%s428_s25] sm:$0xff]  ;;  %v481_v9 = vld [vmem:[%s428_s25 + $0x8] sm:$0xff]  ;;  %v483_v12 = vld [vmem:[%s428_s25 + $0x18] sm:$0xff]  ;;  %s2726_s25 = smov 88   ;;  %s2727_s14 = smov 80   ;;  %vm661_vm4 = vcmask 130048  }
  0x63   : > { %v2354_v11 = vpack.c.bf16 %v481_v9, %v480_v8  ;;  %v2358_v13 = vpack.c.bf16 %v483_v12, %v482_v10  ;;  %v2115_v21 = vld [vmem:[%s423_s18] ss:$0 sm:$0xff]  ;;  %s2725_s18 = smov 96   ;;  %s2728_s17 = smov 112   ;;  %vm2988_vm3 = vmpackc.low %vm577_vm2, %vm577_vm2  ;;  %v570_v47 = vld [vmem:[%s3167_s0 + $0x8] sm:$0xff]  ;;  %vm1856_vm5 = vcmask 523264  }
  0x64   : > { %v457_v6 = vsel %vm456_vm1, %v454_v4, 0.0  ;;  %v460_v7 = vsel %vm456_vm1, %v455_v5, 0.0  ;;  %v569_v48 = vld [vmem:[%s3167_s0] sm:$0xff]  ;;  %v2125_v55 = vld [vmem:[%s3167_s0 + $0x18] sm:$0xff]  ;;  %v2124_v56 = vld [vmem:[%s3167_s0 + $0x10] sm:$0xff]  ;;  %s2733_s16 = smov 48  }
  0x65   : > { %458 = vadd.xlane.f32.xlu0 %v457_v6  ;;  %2355 = vmatprep.subr.bf16.mxu1 %v2354_v11  ;;  %p2161_p4 = scmp.ne.s32.totalorder %s2807_s13, 1 }
  0x66   : > { %2357 = vmatpush3.bf16.msra.mxu1 %v2354_v11 }
  0x67   : > { %2359 = vmatprep.subr.bf16.mxu1 %v2358_v13 }
  0x69   : > { %461 = vadd.xlane.f32.xlu0 %v460_v7 }
  0x6a   : > { %2361 = vmatpush3.bf16.msra.mxu1 %v2358_v13 }
  0xf2   : > { %v459_v14 = vpop.xlane.xlu0 %458 }
  0xf3   : > { %v464_v15 = vmul.f32 0.03125, %v459_v14 }
  0xf5   : > { %v466_v16 = vadd.f32 1e-06, %v464_v15 }
  0xf6   : > { %v462_v17 = vpop.xlane.xlu0 %461 }
  0xf7   : > { %2544 = vrsqrt.f32 %v466_v16  ;;  %v465_v18 = vmul.f32 0.03125, %v462_v17 }
  0xf9   : > { %v467_v19 = vadd.f32 1e-06, %v465_v18 }
  0xfb   : > { %2546 = vrsqrt.f32 %v467_v19 }
 0x101   : > { %v2545_v20 = vpop.eup %2544 }
 0x102   : > { %v470_v22 = vmul.f32 %v2545_v20, %v2950_v2 }
 0x104   : > { %v478_v23 = vmul.f32 %v2115_v21, %v470_v22 }
 0x105   : > { %v2547_v24 = vpop.eup %2546 }
 0x106   : > { %v471_v25 = vmul.f32 %v2547_v24, %v2952_v3  ;;  %2245 = vmatprep.mubr.msk.f32.mxu1 %vm456_vm1, %v478_v23  ;;  %v2137_v23 = vld [vmem:[%s3167_s0 + $0x28] sm:$0xff] }
 0x108   : > { %v479_v26 = vmul.f32 %v2115_v21, %v471_v25  ;;  %v2136_v25 = vld [vmem:[%s3167_s0 + $0x20] sm:$0xff] }
 0x10a   : > { %2246 = vmatmul.mubr.msk.f32.vlgmr.msra.gmra.mrb[0].mxu1 %vm456_vm1, %v479_v26 }
 0x1dd   : > { %v2969_v27 = vpop.f32.mrb[0].mxu1 }
 0x1de   : > { %v2971_v28 = vpop.f32.mrb[1].mxu1 }
 0x1df   : > { %774 = vrot.lane.b32.xlu0 %v2971_v28, %s2724_s29  ;;  %2252 = vmatprep.mubr.msk.f32.mxu1 %vm577_vm2, %v2971_v28  ;;  %v2978_v29 = vpack.i.bf16 %v2969_v27, %v2971_v28 }
 0x1e1   : > { %2505 = vrot.lane.b32.xlu1 %v2978_v29, %s2725_s18  ;;  %s2729_s18 = smov 64  }
 0x1e5   : > { %2510 = vrot.lane.b32.xlu1 %v2978_v29, %s2726_s25  ;;  %s2730_s25 = smov 56  }
 0x1e9   : > { %776 = vrot.lane.b32.xlu1 %v2969_v27, %s2724_s29 }
 0x1ed   : > { %2515 = vrot.lane.b32.xlu1 %v2978_v29, %s2727_s14  ;;  %s2731_s14 = smov 72  }
 0x1f1   : > { %1139 = vrot.lane.b32.xlu1 %v2971_v28, %s2728_s17 }
 0x1f5   : > { %1141 = vrot.lane.b32.xlu1 %v2969_v27, %s2728_s17  ;;  %s2732_s17 = smov 104  }
 0x251   : > { %v775_v41 = vpop.permute.xlu0 %774 }
 0x253   : > { %v2506_v30 = vpop.permute.xlu1 %2505 }
 0x254   : > { %v2508_v31 = vunpack.i.h.bf16 %v2506_v30  ;;  %v2507_v32 = vunpack.i.l.bf16 %v2506_v30 }
 0x256   : > { %v2362_v34 = vpack.c.bf16 %v2508_v31, %v2507_v32 }
 0x257   : > { %v2511_v35 = vpop.permute.xlu1 %2510 }
 0x258   : > { %v2513_v36 = vunpack.i.h.bf16 %v2511_v35  ;;  %v2512_v37 = vunpack.i.l.bf16 %v2511_v35  ;;  %2364 = vmatprep.subr.msk.bf16.mxu1 %vm2988_vm3, %v2362_v34 }
 0x259   : > { %2367 = vmatpush3.bf16.xpose.msk.msra.mxu1 %vm2988_vm3, %v2362_v34 }
 0x25a   : > { %v2372_v38 = vpack.c.bf16 %v2513_v36, %v2512_v37 }
 0x25b   : > { %v777_v39 = vpop.permute.xlu1 %776 }
 0x25c   : > { %2374 = vmatprep.subr.msk.bf16.mxu1 %vm2988_vm3, %v2372_v38 }
 0x25f   : > { %v2516_v40 = vpop.permute.xlu1 %2515 }
 0x260   : > { %v2518_v42 = vunpack.i.h.bf16 %v2516_v40  ;;  %v2517_v43 = vunpack.i.l.bf16 %v2516_v40  ;;  %2253 = vmatmul.mubr.msk.f32.vlgmr.msra.gmra.mrb[2].mxu1 %vm577_vm2, %v2969_v27 }
 0x261   : > { %2377 = vmatpush3.bf16.xpose.msk.msra.mxu1 %vm2988_vm3, %v2372_v38  ;;  %2266 = vmatprep.mubr.msk.f32.mxu1 %vm577_vm2, %v775_v41 }
 0x262   : > { %v2382_v44 = vpack.c.bf16 %v2518_v42, %v2517_v43 }
 0x263   : > { %v1140_v45 = vpop.permute.xlu1 %1139 }
 0x264   : > { %2384 = vmatprep.subr.msk.bf16.mxu1 %vm2988_vm3, %v2382_v44 }
 0x267   : > { %v1142_v46 = vpop.permute.xlu1 %1141 }
 0x268   : > { %2267 = vmatmul.mubr.msk.f32.vlgmr.msra.gmra.mrb[4].mxu1 %vm577_vm2, %v777_v39 }
 0x269   : > { %2387 = vmatpush3.bf16.xpose.msk.msra.mxu1 %vm2988_vm3, %v2382_v44  ;;  %2290 = vmatprep.mubr.msk.f32.mxu1 %vm577_vm2, %v1140_v45 }
 0x270   : > { %2291 = vmatmul.mubr.msk.f32.vlgmr.msra.gmra.mrb[6].mxu1 %vm577_vm2, %v1142_v46 }
 0x333   : > { %v2254_v49 = vpop.f32.mrb[2].mxu1 }
 0x334   : > { %v658_v50 = vadd.f32 %v2254_v49, %v570_v47  ;;  %v652_v51 = vpop.f32.mrb[3].mxu1 }
 0x335   : > { %v653_v52 = vadd.f32 %v652_v51, %v569_v48 }
 0x336   : > { %v665_v53 = vsel %vm661_vm4, %v658_v50, -inf }
 0x337   : > { %666 = vmax.xlane.f32.xlu0 %v665_v53  ;;  %v662_v54 = vsel %vm661_vm4, %v653_v52, -inf }
 0x338   : > { %663 = vmax.xlane.f32.xlu1 %v662_v54 }
 0x33b   : > { %v2268_v57 = vpop.f32.mrb[4].mxu1 }
 0x33c   : > { %v862_v58 = vadd.f32 %v2268_v57, %v2125_v55  ;;  %v856_v59 = vpop.f32.mrb[5].mxu1 }
 0x33d   : > { %v857_v60 = vadd.f32 %v2124_v56, %v856_v59 }
 0x33e   : > { %v868_v61 = vsel %vm661_vm4, %v862_v58, -inf }
 0x33f   : > { %869 = vmax.xlane.f32.xlu0 %v868_v61  ;;  %v865_v62 = vsel %vm661_vm4, %v857_v60, -inf }
 0x340   : > { %866 = vmax.xlane.f32.xlu1 %v865_v62 }
 0x343   : > { %v2292_v63 = vpop.f32.mrb[6].mxu1 }
 0x344   : > { %v1221_v0 = vpop.f32.mrb[7].mxu1  ;;  %v1227_v24 = vadd.f32 %v2292_v63, %v2137_v23 }
 0x345   : > { %v1222_v30 = vadd.f32 %v2136_v25, %v1221_v0 }
 0x346   : > { %v1233_v26 = vsel %vm661_vm4, %v1227_v24, -inf }
 0x347   : > { %v1230_v31 = vsel %vm661_vm4, %v1222_v30, -inf }
 0x3c4   : > { %v667_v1 = vpop.xlane.xlu0 %666 }
 0x3c5   : > { %v669_v4 = vsub.f32 %v658_v50, %v667_v1  ;;  %v664_v5 = vpop.xlane.xlu1 %663 }
 0x3c6   : > { %v668_v6 = vsub.f32 %v653_v52, %v664_v5  ;;  %v565_v5 = vld [vmem:[%s2936_s23] sm:$0xff] }
 0x3c7   : > { %v672_v7 = vmul.f32 1.442695, %v669_v4  ;;  %v566_v4 = vld [vmem:[%s2936_s23 + $0x8] sm:$0xff] }
 0x3c8   : > { %v670_v8 = vmul.f32 1.442695, %v668_v6 }
 0x3c9   : > { %2548 = vpow2.f32 %v672_v7 }
 0x3ca   : > { %2550 = vpow2.f32 %v670_v8 }
 0x3cc   : > { %v870_v9 = vpop.xlane.xlu0 %869 }
 0x3cd   : > { %v872_v10 = vsub.f32 %v862_v58, %v870_v9  ;;  %v867_v11 = vpop.xlane.xlu1 %866 }
 0x3ce   : > { %v871_v12 = vsub.f32 %v857_v60, %v867_v11 }
 0x3cf   : > { %v875_v13 = vmul.f32 1.442695, %v872_v10 }
 0x3d0   : > { %v873_v14 = vmul.f32 1.442695, %v871_v12 }
 0x3d1   : > { %2552 = vpow2.f32 %v875_v13 }
 0x3d2   : > { %2554 = vpow2.f32 %v873_v14 }
 0x3d3   : > { %v2549_v15 = vpop.eup %2548 }
 0x3d4   : > { %v2551_v16 = vpop.eup %2550  ;;  %v677_v17 = vsel %vm661_vm4, %v2549_v15, 0.0 }
 0x3d5   : > { %678 = vadd.xlane.f32.xlu0 %v677_v17  ;;  %v674_v18 = vsel %vm661_vm4, %v2551_v16, 0.0 }
 0x3d6   : > { %675 = vadd.xlane.f32.xlu1 %v674_v18  ;;  %v2147_v18 = vld [vmem:[%s3167_s0 + $0x38] sm:$0xff] }
 0x3db   : > { %v2553_v19 = vpop.eup %2552 }
 0x3dc   : > { %v2555_v20 = vpop.eup %2554  ;;  %v880_v21 = vsel %vm661_vm4, %v2553_v19, 0.0 }
 0x3dd   : > { %881 = vadd.xlane.f32.xlu0 %v880_v21  ;;  %v877_v22 = vsel %vm661_vm4, %v2555_v20, 0.0 }
 0x3de   : > { %878 = vadd.xlane.f32.xlu1 %v877_v22 }
 0x3ef   : > { %2520 = vrot.lane.b32.xlu1 %v2978_v29, %s2729_s18 }
 0x3f3   : > { %2525 = vrot.lane.b32.xlu0 %v2978_v29, %s2730_s25  ;;  %2530 = vrot.lane.b32.xlu1 %v2978_v29, %s2731_s14  ;;  %s2734_s14 = smov 40  }
 0x3f7   : > { %1427 = vrot.lane.b32.xlu0 %v2969_v27, %s2732_s17  ;;  %1425 = vrot.lane.b32.xlu1 %v2971_v28, %s2732_s17 }
 0x416   : > { %1234 = vmax.xlane.f32.xlu0 %v1233_v26 }
 0x41b   : > { %1231 = vmax.xlane.f32.xlu1 %v1230_v31  ;;  %v567_v31 = vld [vmem:[%s2936_s23 + $0x10] sm:$0xff] }
 0x462   : > { %v679_v27 = vpop.xlane.xlu0 %678 }
 0x463   : > { %v676_v32 = vpop.xlane.xlu1 %675 }
 0x464   : > { %2556 = vrcp.f32 %v676_v32 }
 0x465   : > { %2558 = vrcp.f32 %v679_v27 }
 0x46a   : > { %v882_v28 = vpop.xlane.xlu0 %881 }
 0x46b   : > { %v879_v34 = vpop.xlane.xlu1 %878 }
 0x46c   : > { %2560 = vrcp.f32 %v879_v34 }
 0x46d   : > { %2562 = vrcp.f32 %v882_v28 }
 0x46e   : > { %v2557_v35 = vpop.eup %2556  ;;  %v2526_v36 = vpop.permute.xlu0 %2525 }
 0x46f   : > { %v2521_v37 = vpop.permute.xlu1 %2520  ;;  %v682_v38 = vmul.f32 %v2557_v35, %v2551_v16  ;;  %v2528_v39 = vunpack.i.h.bf16 %v2526_v36  ;;  %v2527_v40 = vunpack.i.l.bf16 %v2526_v36  ;;  %v2559_v44 = vpop.eup %2558  ;;  %v2146_v16 = vld [vmem:[%s3167_s0 + $0x30] sm:$0xff] }
 0x470   : > { %v2523_v41 = vunpack.i.h.bf16 %v2521_v37  ;;  %v2522_v42 = vunpack.i.l.bf16 %v2521_v37  ;;  %v683_v51 = vmul.f32 %v2559_v44, %v2549_v15 }
 0x471   : > { %2259 = vmatprep.mubr.msk.f32.mxu0 %vm661_vm4, %v682_v38  ;;  %v2378_v46 = vpack.c.bf16 %v2528_v39, %v2527_v40 }
 0x472   : > { %v2368_v43 = vpack.c.bf16 %v2523_v41, %v2522_v42  ;;  %v1428_v56 = vpop.permute.xlu0 %1427 }
 0x473   : > { %v2531_v45 = vpop.permute.xlu1 %2530 }
 0x474   : > { %v2533_v47 = vunpack.i.h.bf16 %v2531_v45  ;;  %v2532_v48 = vunpack.i.l.bf16 %v2531_v45  ;;  %2369 = vmatprep.subr.bf16.mxu0 %v2368_v43 }
 0x475   : > { %2371 = vmatpush3.bf16.msra.mxu0 %v2368_v43 }
 0x476   : > { %v2561_v49 = vpop.eup %2560  ;;  %v2392_v50 = vpack.c.bf16 %v2533_v47, %v2532_v48  ;;  %2379 = vmatprep.subr.bf16.mxu0 %v2378_v46 }
 0x477   : > { %v2563_v52 = vpop.eup %2562  ;;  %v1426_v53 = vpop.permute.xlu1 %1425  ;;  %v885_v54 = vmul.f32 %v2561_v49, %v2555_v20  ;;  %v568_v49 = vld [vmem:[%s2936_s23 + $0x18] sm:$0xff] }
 0x478   : > { %2260 = vmatmul.mubr.msk.f32.vlgmr.msra.gmra.mrb[0].mxu0 %vm661_vm4, %v683_v51  ;;  %2394 = vmatprep.subr.msk.bf16.mxu1 %vm2988_vm3, %v2392_v50  ;;  %v886_v55 = vmul.f32 %v2563_v52, %v2553_v19 }
 0x479   : > { %2309 = vmatprep.mubr.msk.f32.mxu1 %vm577_vm2, %v1426_v53  ;;  %2381 = vmatpush3.bf16.msra.mxu0 %v2378_v46 }
 0x47a   : > { %2273 = vmatprep.mubr.msk.f32.mxu0 %vm661_vm4, %v885_v54  ;;  %2397 = vmatpush3.bf16.xpose.msk.msra.mxu1 %vm2988_vm3, %v2392_v50 }
 0x47b   : > { %2276 = vmatprep.subr.mxu0 %v566_v4 }
 0x47c   : > { %2274 = vmatmul.mubr.msk.f32.vlgmr.msra.gmra.mrb[2].mxu0 %vm661_vm4, %v886_v55 }
 0x47d   : > { %2277 = vmatpush3.msra.mxu0 %v566_v4 }
 0x47e   : > { %2281 = vmatprep.subr.mxu0 %v565_v5 }
 0x481   : > { %2310 = vmatmul.mubr.msk.f32.vlgmr.msra.gmra.mrb[8].mxu1 %vm577_vm2, %v1428_v56 }
 0x4a3   : > { %v1235_v57 = vpop.xlane.xlu0 %1234 }
 0x4a4   : > { %v1237_v58 = vsub.f32 %v1227_v24, %v1235_v57 }
 0x4a6   : > { %v1240_v59 = vmul.f32 1.442695, %v1237_v58 }
 0x4a8   : > { %2564 = vpow2.f32 %v1240_v59  ;;  %v1232_v60 = vpop.xlane.xlu1 %1231 }
 0x4a9   : > { %v1236_v61 = vsub.f32 %v1222_v30, %v1232_v60 }
 0x4ab   : > { %v1238_v62 = vmul.f32 1.442695, %v1236_v61 }
 0x4ad   : > { %2566 = vpow2.f32 %v1238_v62 }
 0x4b2   : > { %v2565_v63 = vpop.eup %2564 }
 0x4b3   : > { %v1245_v0 = vsel %vm661_vm4, %v2565_v63, 0.0 }
 0x4b4   : > { %1246 = vadd.xlane.f32.xlu1 %v1245_v0  ;;  %v1736_v0 = vld [vmem:[%s2915_s28 + $0x8] sm:$0xff] }
 0x4b7   : > { %v2567_v33 = vpop.eup %2566 }
 0x4b8   : > { %v1242_v1 = vsel %vm661_vm4, %v2567_v33, 0.0 }
 0x4b9   : > { %1243 = vadd.xlane.f32.xlu0 %v1242_v1  ;;  %v1738_v1 = vld [vmem:[%s2915_s28 + $0x18] sm:$0xff] }
 0x4cf   : > { %2535 = vrot.lane.b32.xlu0 %v2978_v29, %s2733_s16 }
 0x541   : > { %v1247_v9 = vpop.xlane.xlu1 %1246 }
 0x546   : > { %v1244_v6 = vpop.xlane.xlu0 %1243 }
 0x547   : > { %2568 = vrcp.f32 %v1244_v6 }
 0x548   : > { %2570 = vrcp.f32 %v1247_v9 }
 0x54a   : > { %v2536_v7 = vpop.permute.xlu0 %2535 }
 0x54b   : > { %v2261_v8 = vpop.f32.mrb[0].mxu0  ;;  %v2538_v11 = vunpack.i.h.bf16 %v2536_v7  ;;  %v2537_v12 = vunpack.i.l.bf16 %v2536_v7 }
 0x54c   : > { %v762_v10 = vpop.f32.mrb[1].mxu0 }
 0x54d   : > { %v2388_v15 = vpack.c.bf16 %v2538_v11, %v2537_v12  ;;  %v2156_v12 = vld [vmem:[%s436_s20] ss:$0 sm:$0xff] }
 0x54f   : > { %v2275_v13 = vpop.f32.mrb[2].mxu0 }
 0x550   : > { %v965_v14 = vpop.f32.mrb[3].mxu0 }
 0x551   : > { %2278 = vmatprep.mubr.msk.f32.mxu0 %vm577_vm2, %v965_v14  ;;  %v2569_v20 = vpop.eup %2568 }
 0x552   : > { %2279 = vmatmul.mubr.msk.f32.vlgmr.msra.gmra.mrb[4].mxu0 %vm577_vm2, %v2275_v13  ;;  %v2571_v24 = vpop.eup %2570  ;;  %v1250_v25 = vmul.f32 %v2569_v20, %v2567_v33 }
 0x553   : > { %2282 = vmatpush3.msra.mxu0 %v565_v5  ;;  %2283 = vmatprep.mubr.msk.f32.mxu0 %vm577_vm2, %v762_v10  ;;  %v1251_v26 = vmul.f32 %v2571_v24, %v2565_v63  ;;  %v1735_v63 = vld [vmem:[%s2915_s28] sm:$0xff]  ;;  %v1853_v24 = vld [vmem:[%s2946_s1 + $0x28] sm:$0xff] }
 0x554   : > { %2389 = vmatprep.subr.bf16.mxu0 %v2388_v15  ;;  %v2311_v17 = vpop.f32.mrb[8].mxu1  ;;  %v2402_v33 = vpack.c.bf16 %v1736_v0, %v1735_v63 }
 0x555   : > { %v1507_v19 = vpop.f32.mrb[9].mxu1  ;;  %v1513_v22 = vadd.f32 %v2311_v17, %v2147_v18  ;;  %v1848_v17 = vld [vmem:[%s2946_s1] sm:$0xff]  ;;  %v1849_v18 = vld [vmem:[%s2946_s1 + $0x8] sm:$0xff] }
 0x556   : > { %v1508_v21 = vadd.f32 %v2146_v16, %v1507_v19  ;;  %2403 = vmatprep.subr.bf16.mxu1 %v2402_v33  ;;  %v1850_v19 = vld [vmem:[%s2946_s1 + $0x10] sm:$0xff]  ;;  %v2410_v20 = vpack.c.bf16 %v1849_v18, %v1848_v17 }
 0x557   : > { %v1519_v30 = vsel %vm661_vm4, %v1513_v22, -inf  ;;  %2405 = vmatpush3.bf16.msra.mxu1 %v2402_v33 }
 0x558   : > { %v1516_v23 = vsel %vm661_vm4, %v1508_v21, -inf }
 0x559   : > { %1517 = vmax.xlane.f32.xlu1 %v1516_v23  ;;  %v1852_v23 = vld [vmem:[%s2946_s1 + $0x20] sm:$0xff] }
 0x55a   : > { %2284 = vmatmul.mubr.msk.f32.vlgmr.msra.gmra.mrb[4].mxu0 %vm577_vm2, %v2261_v8 }
 0x55b   : > { %2391 = vmatpush3.bf16.msra.mxu0 %v2388_v15  ;;  %2297 = vmatprep.mubr.msk.f32.mxu0 %vm661_vm4, %v1250_v25  ;;  %v2418_v25 = vpack.c.bf16 %v1853_v24, %v1852_v23 }
 0x55c   : > { %2300 = vmatprep.subr.mxu0 %v567_v31 }
 0x55d   : > { %1520 = vmax.xlane.f32.xlu1 %v1519_v30  ;;  %v1855_v30 = vld [vmem:[%s2946_s1 + $0x38] sm:$0xff] }
 0x55e   : > { %2298 = vmatmul.mubr.msk.f32.vlgmr.msra.gmra.mrb[6].mxu0 %vm661_vm4, %v1251_v26  ;;  %v1854_v26 = vld [vmem:[%s2946_s1 + $0x30] sm:$0xff] }
 0x55f   : > { %2301 = vmatpush3.msra.mxu0 %v567_v31  ;;  %v2422_v31 = vpack.c.bf16 %v1855_v30, %v1854_v26 }
 0x5e6   : > { %v1518_v32 = vpop.xlane.xlu1 %1517 }
 0x5e7   : > { %v1522_v27 = vsub.f32 %v1508_v21, %v1518_v32  ;;  %v1851_v21 = vld [vmem:[%s2946_s1 + $0x18] sm:$0xff] }
 0x5e9   : > { %v1524_v35 = vmul.f32 1.442695, %v1522_v27 }
 0x5ea   : > { %v1521_v28 = vpop.xlane.xlu1 %1520 }
 0x5eb   : > { %v1523_v34 = vsub.f32 %v1513_v22, %v1521_v28  ;;  %v2414_v22 = vpack.c.bf16 %v1851_v21, %v1850_v19 }
 0x5ed   : > { %v1526_v36 = vmul.f32 1.442695, %v1523_v34 }
 0x5ef   : > { %2572 = vpow2.f32 %v1526_v36 }
 0x5f0   : > { %2574 = vpow2.f32 %v1524_v35 }
 0x5f9   : > { %v2573_v37 = vpop.eup %2572 }
 0x5fa   : > { %v1531_v38 = vsel %vm661_vm4, %v2573_v37, 0.0  ;;  %v2575_v39 = vpop.eup %2574 }
 0x5fb   : > { %1532 = vadd.xlane.f32.xlu1 %v1531_v38  ;;  %v1528_v40 = vsel %vm661_vm4, %v2575_v39, 0.0 }
 0x5ff   : > { %1529 = vadd.xlane.f32.xlu1 %v1528_v40 }
 0x610   : > { %2540 = vrot.lane.b32.xlu1 %v2978_v29, %s2734_s14 }
 0x631   : > { %v2299_v41 = vpop.f32.mrb[6].mxu0 }
 0x632   : > { %v1330_v42 = vpop.f32.mrb[7].mxu0 }
 0x633   : > { %2302 = vmatprep.mubr.msk.f32.mxu0 %vm577_vm2, %v1330_v42 }
 0x634   : > { %2303 = vmatmul.mubr.msk.f32.vlgmr.msra.gmra.mrb[4].mxu0 %vm577_vm2, %v2299_v41 }
 0x688   : > { %v1533_v43 = vpop.xlane.xlu1 %1532 }
 0x689   : > { %2576 = vrcp.f32 %v1533_v43 }
 0x68c   : > { %v1530_v44 = vpop.xlane.xlu1 %1529 }
 0x68d   : > { %2578 = vrcp.f32 %v1530_v44 }
 0x690   : > { %v2541_v45 = vpop.permute.xlu1 %2540 }
 0x691   : > { %v2543_v46 = vunpack.i.h.bf16 %v2541_v45  ;;  %v2542_v47 = vunpack.i.l.bf16 %v2541_v45 }
 0x693   : > { %v2398_v48 = vpack.c.bf16 %v2543_v46, %v2542_v47  ;;  %v2577_v50 = vpop.eup %2576 }
 0x694   : > { %v1537_v52 = vmul.f32 %v2577_v50, %v2573_v37 }
 0x695   : > { %2399 = vmatprep.subr.bf16.mxu0 %v2398_v48 }
 0x696   : > { %2401 = vmatpush3.bf16.msra.mxu0 %v2398_v48 }
 0x697   : > { %v2579_v51 = vpop.eup %2578  ;;  %2319 = vmatprep.subr.mxu0 %v568_v49 }
 0x698   : > { %v1536_v29 = vmul.f32 %v2579_v51, %v2575_v39 }
 0x69a   : > { %2316 = vmatprep.mubr.msk.f32.mxu0 %vm661_vm4, %v1536_v29 }
 0x69b   : > { %2317 = vmatmul.mubr.msk.f32.vlgmr.msra.gmra.mrb[8].mxu0 %vm661_vm4, %v1537_v52 }
 0x69c   : > { %2320 = vmatpush3.msra.mxu0 %v568_v49 }
 0x69d   : > { %2411 = vmatprep.subr.bf16.mxu0 %v2410_v20 }
 0x76e   : > { %v2318_v53 = vpop.f32.mrb[8].mxu0 }
 0x76f   : > { %v1616_v54 = vpop.f32.mrb[9].mxu0 }
 0x770   : > { %2321 = vmatprep.mubr.msk.f32.mxu0 %vm577_vm2, %v1616_v54 }
 0x771   : > { %2322 = vmatmul.mubr.msk.f32.vlgmr.msra.gmra.mrb[4].mxu0 %vm577_vm2, %v2318_v53 }
 0x772   : > { %2413 = vmatpush3.bf16.msra.mxu0 %v2410_v20 }
 0x773   : > { %2415 = vmatprep.subr.bf16.mxu0 %v2414_v22 }
 0x776   : > { %2417 = vmatpush3.bf16.msra.mxu0 %v2414_v22 }
 0x777   : > { %2419 = vmatprep.subr.bf16.mxu0 %v2418_v25 }
 0x77a   : > { %2421 = vmatpush3.bf16.msra.mxu0 %v2418_v25 }
 0x77b   : > { %2423 = vmatprep.subr.bf16.mxu0 %v2422_v31 }
 0x77e   : > { %2425 = vmatpush3.bf16.msra.mxu0 %v2422_v31 }
 0x844   : > { %v2323_v55 = vpop.f32.mrb[4].mxu0 }
 0x845   : > { %v3085_v56 = vadd.f32 %v2323_v55, %v2952_v3  ;;  %v1697_v57 = vpop.f32.mrb[5].mxu0  ;;  %v1737_v3 = vld [vmem:[%s2915_s28 + $0x10] sm:$0xff] }
 0x846   : > { %v3088_v58 = vadd.f32 %v1697_v57, %v2950_v2  ;;  %v2406_v2 = vpack.c.bf16 %v1738_v1, %v1737_v3 }
 0x847   : > { %v1712_v59 = vmul.f32 %v3085_v56, %v3085_v56 }
 0x848   : > { %v1711_v60 = vmul.f32 %v3088_v58, %v3088_v58  ;;  %2407 = vmatprep.subr.bf16.mxu1 %v2406_v2 }
 0x849   : > { %v1716_v61 = vsel %vm456_vm1, %v1712_v59, 0.0  ;;  %2409 = vmatpush3.bf16.msra.mxu1 %v2406_v2 }
 0x84a   : > { %1717 = vadd.xlane.f32.xlu1 %v1716_v61  ;;  %v1713_v62 = vsel %vm456_vm1, %v1711_v60, 0.0 }
 0x84b   : > { %1714 = vadd.xlane.f32.xlu0 %v1713_v62 }
 0x8d7   : > { %v1718_v4 = vpop.xlane.xlu1 %1717 }
 0x8d8   : > { %v1720_v5 = vmul.f32 0.03125, %v1718_v4  ;;  %v1715_v6 = vpop.xlane.xlu0 %1714  ;;  %v2162_v4 = vld [vmem:[%s3175_s8] ss:$0 sm:$0xff] (!%p2161_p4) }
 0x8d9   : > { %v1719_v7 = vmul.f32 0.03125, %v1715_v6 }
 0x8da   : > { %v1722_v8 = vadd.f32 1e-06, %v1720_v5 }
 0x8db   : > { %v1721_v9 = vadd.f32 1e-06, %v1719_v7 }
 0x8dc   : > { %2580 = vrsqrt.f32 %v1722_v8 }
 0x8dd   : > { %2582 = vrsqrt.f32 %v1721_v9 }
 0x8e6   : > { %v2581_v10 = vpop.eup %2580 }
 0x8e7   : > { %v2583_v11 = vpop.eup %2582  ;;  %v1726_v13 = vmul.f32 %v2581_v10, %v3085_v56 }
 0x8e8   : > { %v1725_v14 = vmul.f32 %v2583_v11, %v3088_v58 }
 0x8e9   : > { %v1734_v16 = vmul.f32 %v2156_v12, %v1726_v13 }
 0x8ea   : > { %v1733_v15 = vmul.f32 %v2156_v12, %v1725_v14 }
 0x8ec   : > { %2332 = vmatprep.mubr.msk.f32.mxu1 %vm456_vm1, %v1733_v15 }
 0x8ed   : > { %2333 = vmatmul.mubr.msk.f32.vlgmr.msra.gmra.mrb[10].mxu1 %vm456_vm1, %v1734_v16 }
 0x9c0   : > { %v2334_v32 = vpop.f32.mrb[10].mxu1 }
 0x9c1   : > { %1842 = vrot.lane.b32.xlu1 %v2334_v32, %s2729_s18  ;;  %v1811_v27 = vpop.f32.mrb[11].mxu1  ;;  %v1823_v34 = vmul.f32 0.044715, %v2334_v32  ;;  %v1821_v48 = vmul.f32 0.5, %v2334_v32 }
 0x9c2   : > { %1840 = vrot.lane.b32.xlu0 %v1811_v27, %s2729_s18  ;;  %v1822_v28 = vmul.f32 0.044715, %v1811_v27  ;;  %v1820_v47 = vmul.f32 0.5, %v1811_v27 }
 0x9c3   : > { %v1825_v36 = vmul.f32 %v2334_v32, %v1823_v34 }
 0x9c4   : > { %v1824_v35 = vmul.f32 %v1822_v28, %v1811_v27 }
 0x9c5   : > { %v1827_v38 = vmul.f32 %v2334_v32, %v1825_v36 }
 0x9c6   : > { %v1826_v37 = vmul.f32 %v1824_v35, %v1811_v27 }
 0x9c7   : > { %v1829_v40 = vadd.f32 %v2334_v32, %v1827_v38 }
 0x9c8   : > { %v1828_v39 = vadd.f32 %v1826_v37, %v1811_v27 }
 0x9c9   : > { %v1831_v42 = vmul.f32 0.7978846, %v1829_v40 }
 0x9ca   : > { %v1830_v41 = vmul.f32 0.7978846, %v1828_v39 }
 0x9cc   : > { %2584 = vtanh.f32 %v1830_v41 }
 0x9cd   : > { %2586 = vtanh.f32 %v1831_v42 }
 0x9d6   : > { %v2585_v43 = vpop.eup %2584 }
 0x9d7   : > { %v2587_v44 = vpop.eup %2586  ;;  %v1834_v45 = vadd.f32 1.0, %v2585_v43 }
 0x9d8   : > { %v1835_v46 = vadd.f32 1.0, %v2587_v44 }
 0x9d9   : > { %v1836_v50 = vmul.f32 %v1834_v45, %v1820_v47 }
 0x9da   : > { %v1837_v51 = vmul.f32 %v1835_v46, %v1821_v48 }
 0xa33   : > { %v1843_v49 = vpop.permute.xlu1 %1842 }
 0xa34   : > { %v1841_v29 = vpop.permute.xlu0 %1840  ;;  %v1847_v53 = vmul.f32 %v1843_v49, %v1837_v51 }
 0xa35   : > { %v1846_v52 = vmul.f32 %v1841_v29, %v1836_v50 }
 0xa37   : > { %2351 = vmatprep.mubr.msk.f32.mxu0 %vm1856_vm5, %v1846_v52 }
 0xa38   : > { %2352 = vmatmul.mubr.msk.f32.vlgmr.msra.gmra.mrb[10].mxu0 %vm1856_vm5, %v1847_v53 }
 0xb09   : > { %1945 = sbr.rel (%p2161_p4) target bundleno = 3000 (0xbb8), region = 72 }
 0xb0b   : > { %v2353_v54 = vpop.f32.mrb[10].mxu0 }
 0xb0c   : > { %v1939_v55 = vadd.f32 %v2353_v54, %v3085_v56  ;;  %v1929_v57 = vpop.f32.mrb[11].mxu0 }
 0xb0d   : > { %v1938_v59 = vadd.f32 %v1929_v57, %v3088_v58 }
 0xb0e   : > { %1941 = vst.msk [vmem:[#allocation2 + $0x8] sm:$0xff] %vm456_vm1, %v1939_v55  ;;  %v1948_v61 = vmul.f32 (!%p2161_p4), %v1939_v55, %v1939_v55 }
 0xb0f   : > { %1940 = vst.msk [vmem:[#allocation2] sm:$0xff] %vm456_vm1, %v1938_v59  ;;  %v1947_v60 = vmul.f32 (!%p2161_p4), %v1938_v59, %v1938_v59 }
 0xb10   : > { %v1952_v63 = vsel %vm456_vm1, %v1948_v61, 0.0 }
 0xb11   : > { %v1949_v62 = vsel %vm456_vm1, %v1947_v60, 0.0 }
 0xb12   : > { %1950 = vadd.xlane.f32.xlu0 %v1949_v62 }
 0xb16   : > { %1953 = vadd.xlane.f32.xlu0 %v1952_v63 }
 0xb9f   : > { %v1951_v0 = vpop.xlane.xlu0 %1950 }
 0xba0   : > { %v1955_v56 = vmul.f32 0.03125, %v1951_v0 }
 0xba2   : > { %v1957_v3 = vadd.f32 1e-06, %v1955_v56 }
 0xba3   : > { %v1954_v33 = vpop.xlane.xlu0 %1953 }
 0xba4   : > { %2588 = vrsqrt.f32 %v1957_v3  ;;  %v1956_v58 = vmul.f32 0.03125, %v1954_v33 }
 0xba6   : > { %v1958_v1 = vadd.f32 1e-06, %v1956_v58 }
 0xba8   : > { %2590 = vrsqrt.f32 %v1958_v1 }
 0xbae   : > { %v2589_v2 = vpop.eup %2588 }
 0xbaf   : > { %v1961_v5 = vmul.f32 %v2589_v2, %v1938_v59 }
 0xbb1   : > { %v1969_v6 = vmul.f32 %v2162_v4, %v1961_v5 }
 0xbb2   : > { %v2591_v7 = vpop.eup %2590 }
 0xbb3   : > { %1971 = vst.msk [vmem:[#allocation8] sm:$0xff] %vm456_vm1, %v1969_v6  ;;  %v1962_v8 = vmul.f32 %v2591_v7, %v1939_v55 }
 0xbb5   : > { %v1970_v9 = vmul.f32 %v2162_v4, %v1962_v8 }
 0xbb7   : > { %1972 = vst.msk [vmem:[#allocation8 + $0x8] sm:$0xff] %vm456_vm1, %v1970_v9 }
 0xbb8 PF: > { %p2453_p5 = scmp.eq.s32.totalorder %s2807_s13, 1  ;;  %s2735_s20 = smov [#allocation8]  }
 0xbb9   : > { %s1979_s18 = sshll.u32 %s2735_s20, 4  ;;  %s1980_s18 = int_to_ptr.vmem [resolvable:$true] %s1979_s18 }
 0xbba   : > { %s2650_s17 = scalar_lea.vmem %s1980_s18, 256  ;;  %p2657_p12 = scmp.lt.s32.totalorder %s1980_s18, %s1980_s18 }
 0xbbb   : > { %p2651_p6 = scmp.ne.s32.totalorder %s1980_s18, %s2650_s17  ;;  %p2658_p0 = scmp.lt.s32.totalorder %s2650_s17, %s2650_s17 }
 0xbbd   : > { %p2652_p9 = pnand %p2651_p6, %p2453_p5  ;;  %p2659_p2 = por %p2658_p0, %p2657_p12 }
 0xbbf   : > { %p2653_p10 = pneg %p2652_p9 }
 0xbc1   : > { %p2660_p11 = pnand %p2659_p2, %p2653_p10 }
 0xbc3   : > { %2663 = shalt.err (!%p2660_p11)
}
 0xbc4   : > { %s2664_s27 = scalar_lea.hbm %s3176_s9, 256 }
 0xbc5   : > { %p2665_p13 = scmp.ne.s32.totalorder %s3176_s9, %s2664_s27  ;;  %p2670_p8 = scmp.lt.u32.totalorder %s2664_s27, %s3176_s9 }
 0xbc7   : > { %p2666_p3 = pnand %p2665_p13, %p2453_p5 }
 0xbc9   : > { %p2667_p7 = pneg %p2666_p3 }
 0xbcb   : > { %p2672_p1 = pnand %p2670_p8, %p2667_p7 }
 0xbcd   : > { %2675 = shalt.err (!%p2672_p1)
}
 0xbce   : > { %s2736_s29 = smov 128   ;;  %s2737_s25 = smov 8  }
 0xbcf   : > { %2439 = dma.vmem_to_hbm [thread:$0]  (%p2453_p5), %s1980_s18, 256, %s3176_s9, [#allocation5], %s2736_s29, %s2736_s29, %s2737_s25  }
 0xbd0   : > { %2701 = dma.done.wait (%p2453_p5), [#allocation5], 256  }
 0xbd1   : > { %2703 = vsyncadd (%p2453_p5), [#allocation5], 4294967040 }
 0xbd2 PF: > { %p21_p4 = scmp.ge.s32.totalorder %s2833_s19, 4   ;;  %s3193_s30 = smov %s2710_s10 }
 0xbd3   : > { %s3194_s10 = smov %s2714_s11  ;;  %s3195_s11 = smov %s2862_s24 }
 0xbd4   : > { %s3196_s12 = smov %s2833_s19  ;;  %23 = sbr.rel (!%p21_p4) target bundleno = 7 (0x7), region = 124 }
 0xbdb   :  { %1995 = vsyncpa [#allocation4], 1 }
 0xbdc   :  { %1997 = vsyncpa [#allocation4 + $0x1], 1 }
 0xbdd   :  { %1998 = vsyncpa [#allocation7], 1 }
 0xbde   :  { %2000 = vsyncpa [#allocation7 + $0x1], 1 }
 0xbdf   :  { %2001 = vsyncpa [#allocation5], 1 }
 0xbe0   :  { %2003 = vsyncpa [#allocation5 + $0x1], 1 }

</bundles_post_ra>
